<compile_context>
chip_gen: v5e
topology: v5e:2x2
jax: 0.10.0
libtpu: 0.0.40
codegen_flags: <defaults>
</compile_context>

<pallas_src>
import math

import jax
import jax.numpy as jnp
from jax.experimental import pallas as pl
from jax.experimental.pallas import tpu as pltpu

_SUBLANES = 8


def _cdiv(a, b):
    return -(-a // b)


def _round_up(x, m):
    return _cdiv(x, m) * m


def _tpu_defaults():
    """Per-generation (nsplit, per-input block bytes, VMEM capacity bytes)."""
    kind = ""
    try:
        kind = (getattr(jax.devices()[0], "device_kind", "") or "").lower()
    except Exception:
        pass
    if "v7" in kind:
        # 2 TensorCores, 64 MiB VMEM: 4 inputs x 2 buffers x 4 MiB = 32 MiB.
        return 2, 4 << 20, 64 << 20
    if "v2" in kind or "v3" in kind:
        # Small-VMEM legacy chips: stay conservative.
        return 1, 1 << 20, 16 << 20
    # v5e / v6e / v5p / v4 (and unknown fallback): 1 TC split, 128 MiB VMEM.
    return 1, 8 << 20, 128 << 20


def simsiam_loss(feature_1, feature_2, proj_1, proj_2, *,
                 target_block_bytes=None, nsplit=None):
    """Pallas implementation of SimSiamLoss.forward. Inputs share shape [..., D]."""
    assert feature_1.shape == feature_2.shape == proj_1.shape == proj_2.shape
    assert feature_1.dtype == feature_2.dtype == proj_1.dtype == proj_2.dtype
    shape = feature_1.shape
    dtype = feature_1.dtype
    itemsize = jnp.dtype(dtype).itemsize

    d = shape[-1]
    rows = max(1, math.prod(shape[:-1]))  # true mean denominator
    denom = rows

    auto_split, auto_block, vmem_cap = _tpu_defaults()
    if nsplit is None:
        nsplit = auto_split
    if target_block_bytes is None:
        target_block_bytes = auto_block

    # (..., D) -> (R, D): flatten only the leading batch dims (layout-free).
    f1, f2, p1, p2 = (x.reshape(rows, d)
                      for x in (feature_1, feature_2, proj_1, proj_2))

    # Row alignment keeps the sublane tiling native for narrow dtypes too
    # (8 rows for 32-bit, 16 for 16-bit, 32 for 8-bit inputs).
    row_align = max(_SUBLANES, 32 // itemsize)
    row_bytes = d * itemsize
    target_rows = max(row_align,
                      (target_block_bytes // max(1, row_bytes)) // row_align * row_align)
    tile_r = min(target_rows, _round_up(_cdiv(rows, nsplit), row_align))
    # TODO(synk): for extreme D (a single 8-row block near the VMEM budget) a
    # D-tiled variant would be needed; not implemented here.

    def _coverage(t):
        return nsplit * _cdiv(_cdiv(rows, t), nsplit) * t

    # Bound wasted DMA from over-coverage of the row range to ~12.5%.
    while tile_r > row_align and (_coverage(tile_r) - rows) * 8 > rows:
        tile_r = max(row_align, _round_up(tile_r // 2, row_align))

    tiles_total = _cdiv(rows, tile_r)
    tiles_per_split = _cdiv(tiles_total, nsplit)
    coverage = nsplit * tiles_per_split * tile_r
    need_mask = coverage != rows
    last_block = tiles_total - 1
    grid = (nsplit, tiles_per_split)

    def kernel(f1_ref, f2_ref, p1_ref, p2_ref, out_ref):
        g = pl.program_id(0)
        i = pl.program_id(1)

        @pl.when(i == 0)
        def _init():
            out_ref[...] = jnp.zeros_like(out_ref)

        # Cast up first: f32 math avoids bf16 packed-tile relayouts on the
        # reshape below and matches the reference accuracy; HBM-bound kernel,
        # so the extra VPU work is free.
        a1 = f1_ref[...].astype(jnp.float32)
        a2 = f2_ref[...].astype(jnp.float32)
        b1 = p1_ref[...].astype(jnp.float32)
        b2 = p2_ref[...].astype(jnp.float32)
        prod = b1 * a2 + b2 * a1  # (tile_r, D) f32

        if need_mask:
            base = (g * tiles_per_split + i) * tile_r
            row = base + jax.lax.broadcasted_iota(jnp.int32, (tile_r, 1), 0)
            # Rows past the true extent (ragged tail / clamped duplicate tile)
            # contribute zero; jnp.where also kills any garbage read from the
            # partially out-of-bounds last block.
            prod = jnp.where(row < rows, prod, 0.0)

        # Sublane-group reduce (aligned, no tile-boundary crossing).
        partial = jnp.sum(prod.reshape(tile_r // _SUBLANES, _SUBLANES, d), axis=0)
        out_ref[...] += partial

    def in_map(g, i):
        # Clamp so a fully out-of-range trailing block on an uneven split just
        # re-reads the last valid tile; its contribution is masked to zero.
        b = g * tiles_per_split + i
        return (jnp.minimum(b, last_block), 0)

    in_spec = pl.BlockSpec((tile_r, d), in_map)
    out_spec = pl.BlockSpec((_SUBLANES, d), lambda g, i: (g, 0))

    block_bytes = tile_r * d * itemsize
    out_block_bytes = _SUBLANES * d * 4
    vmem_bytes = min(vmem_cap,
                     4 * 2 * block_bytes + 2 * 2 * out_block_bytes + (4 << 20))

    partials = pl.pallas_call(
        kernel,
        out_shape=jax.ShapeDtypeStruct((nsplit * _SUBLANES, d), jnp.float32),
        grid=grid,
        in_specs=[in_spec, in_spec, in_spec, in_spec],
        out_specs=out_spec,
        compiler_params=pltpu.CompilerParams(
            # On v7x, if xprof shows a single busy TensorCore, switch the split
            # axis to pltpu.CORE_PARALLEL; "parallel" is a no-op on 1-TC chips.
            dimension_semantics=("parallel", "arbitrary"),
            vmem_limit_bytes=int(vmem_bytes),
        ),
        cost_estimate=pl.CostEstimate(
            flops=4 * rows * d,
            transcendentals=0,
            bytes_accessed=4 * rows * d * itemsize,
        ),
    )(f1, f2, p1, p2)

    # Tiny (nsplit*8, D) final reduce + single scale outside the kernel.
    return (-0.5 / denom) * jnp.sum(partials)


def simsiam_loss_ref(feature_1, feature_2, proj_1, proj_2):
    """Pure-JAX reference mirroring the PyTorch module exactly."""
    sim_1 = -jnp.mean(jnp.sum(proj_1 * jax.lax.stop_gradient(feature_2), axis=-1))
    sim_2 = -jnp.mean(jnp.sum(proj_2 * jax.lax.stop_gradient(feature_1), axis=-1))
    return 0.5 * sim_1 + 0.5 * sim_2


if __name__ == "__main__":
    key = jax.random.PRNGKey(0)
    ks = jax.random.split(key, 12)

    # 1) Small [B, D] case matching the module's convention.
    B, D = 8, 32
    f1 = jax.random.normal(ks[0], (B, D), dtype=jnp.float32)
    f2 = jax.random.normal(ks[1], (B, D), dtype=jnp.float32)
    p1 = jax.random.normal(ks[2], (B, D), dtype=jnp.float32)
    p2 = jax.random.normal(ks[3], (B, D), dtype=jnp.float32)
    out = simsiam_loss(f1, f2, p1, p2)
    jax.block_until_ready(out)
    ref = simsiam_loss_ref(f1, f2, p1, p2)
    assert jnp.allclose(out, ref, rtol=1e-5, atol=1e-5), (out, ref)

    # 2) Ragged row count + tiny blocks: multi-step inner reduction axis,
    #    accumulator init/accumulate across the grid, in-kernel tail mask.
    g1 = jax.random.normal(ks[4], (2, 7, 384), dtype=jnp.float32)
    g2 = jax.random.normal(ks[5], (2, 7, 384), dtype=jnp.float32)
    q1 = jax.random.normal(ks[6], (2, 7, 384), dtype=jnp.float32)
    q2 = jax.random.normal(ks[7], (2, 7, 384), dtype=jnp.float32)
    out2 = simsiam_loss(g1, g2, q1, q2, target_block_bytes=8 * 1024)
    jax.block_until_ready(out2)
    ref2 = simsiam_loss_ref(g1, g2, q1, q2)
    assert jnp.allclose(out2, ref2, rtol=1e-4, atol=1e-4), (out2, ref2)

    # 3) Force the 2-way split on an odd tile count: exercises the clamped
    #    index_map (fully out-of-range trailing tile) on any generation.
    h1 = jax.random.normal(ks[8], (24, 128), dtype=jnp.float32)
    h2 = jax.random.normal(ks[9], (24, 128), dtype=jnp.float32)
    r1 = jax.random.normal(ks[10], (24, 128), dtype=jnp.float32)
    r2 = jax.random.normal(ks[11], (24, 128), dtype=jnp.float32)
    out3 = simsiam_loss(h1, h2, r1, r2, target_block_bytes=4 * 1024, nsplit=2)
    jax.block_until_ready(out3)
    ref3 = simsiam_loss_ref(h1, h2, r1, r2)
    assert jnp.allclose(out3, ref3, rtol=1e-5, atol=1e-5), (out3, ref3)

    print("KERNEL_OK")
</pallas_src>

<mosaic_0001>
module attributes {stable_mosaic.version = 11 : i64} {
  func.func @kernel(%arg0: i32, %arg1: i32, %arg2: memref<8x32xf32, #tpu.memory_space<vmem>>, %arg3: memref<8x32xf32, #tpu.memory_space<vmem>>, %arg4: memref<8x32xf32, #tpu.memory_space<vmem>>, %arg5: memref<8x32xf32, #tpu.memory_space<vmem>>, %arg6: memref<8x32xf32, #tpu.memory_space<vmem>>) attributes {dimension_semantics = [#tpu.dimension_semantics<parallel>, #tpu.dimension_semantics<arbitrary>], iteration_bounds = array<i64: 1, 1>, scalar_prefetch = 0 : i64, scratch_operands = 0 : i64, tpu.core_type = #tpu.core_type<tc>, window_params = [{transform_indices = @transform_0, window_bounds = array<i64: 8, 32>}, {transform_indices = @transform_1, window_bounds = array<i64: 8, 32>}, {transform_indices = @transform_2, window_bounds = array<i64: 8, 32>}, {transform_indices = @transform_3, window_bounds = array<i64: 8, 32>}, {transform_indices = @transform_4, window_bounds = array<i64: 8, 32>}]} {
    %c0_i32 = arith.constant 0 : i32
    %0 = arith.cmpi eq, %arg1, %c0_i32 : i32
    %1 = arith.extui %0 : i1 to i32
    %c0_i32_0 = arith.constant 0 : i32
    %2 = arith.cmpi ne, %1, %c0_i32_0 : i32
    scf.if %2 {
      %cst_12 = arith.constant 0.000000e+00 : f32
      %15 = vector.broadcast %cst_12 : f32 to vector<8x32xf32>
      %c0_13 = arith.constant 0 : index
      %c0_14 = arith.constant 0 : index
      %16 = vector.load %arg6[%c0_13, %c0_14] : memref<8x32xf32, #tpu.memory_space<vmem>>, vector<8x32xf32>
      tpu.vector_store %arg6[%c0_13, %c0_14], %15 {strides = array<i32>} : memref<8x32xf32, #tpu.memory_space<vmem>>, vector<8x32xf32>,
    } else {
    }
    %c0 = arith.constant 0 : index
    %c0_1 = arith.constant 0 : index
    %3 = vector.load %arg2[%c0, %c0_1] : memref<8x32xf32, #tpu.memory_space<vmem>>, vector<8x32xf32>
    %c0_2 = arith.constant 0 : index
    %c0_3 = arith.constant 0 : index
    %4 = vector.load %arg3[%c0_2, %c0_3] : memref<8x32xf32, #tpu.memory_space<vmem>>, vector<8x32xf32>
    %c0_4 = arith.constant 0 : index
    %c0_5 = arith.constant 0 : index
    %5 = vector.load %arg4[%c0_4, %c0_5] : memref<8x32xf32, #tpu.memory_space<vmem>>, vector<8x32xf32>
    %c0_6 = arith.constant 0 : index
    %c0_7 = arith.constant 0 : index
    %6 = vector.load %arg5[%c0_6, %c0_7] : memref<8x32xf32, #tpu.memory_space<vmem>>, vector<8x32xf32>
    %7 = arith.mulf %5, %4 : vector<8x32xf32>
    %8 = arith.mulf %6, %3 : vector<8x32xf32>
    %9 = arith.addf %7, %8 : vector<8x32xf32>
    %10 = vector.shape_cast %9 : vector<8x32xf32> to vector<1x8x32xf32>
    %cst = arith.constant dense<0.000000e+00> : vector<8x32xf32>
    %11 = vector.multi_reduction <add>, %10, %cst [0] : vector<1x8x32xf32> to vector<8x32xf32>
    %c0_8 = arith.constant 0 : index
    %c0_9 = arith.constant 0 : index
    %12 = vector.load %arg6[%c0_8, %c0_9] : memref<8x32xf32, #tpu.memory_space<vmem>>, vector<8x32xf32>
    %13 = arith.addf %12, %11 : vector<8x32xf32>
    %c0_10 = arith.constant 0 : index
    %c0_11 = arith.constant 0 : index
    %14 = vector.load %arg6[%c0_10, %c0_11] : memref<8x32xf32, #tpu.memory_space<vmem>>, vector<8x32xf32>
    tpu.vector_store %arg6[%c0_10, %c0_11], %13 {strides = array<i32>} : memref<8x32xf32, #tpu.memory_space<vmem>>, vector<8x32xf32>,
    return
  }
  func.func @transform_0(%arg0: i32, %arg1: i32) -> (i32, i32) {
    %c1_i32 = arith.constant 1 : i32
    %0 = arith.muli %arg0, %c1_i32 : i32
    %1 = arith.addi %0, %arg1 : i32
    %c0_i32 = arith.constant 0 : i32
    %2 = arith.minsi %1, %c0_i32 : i32
    %c0_i32_0 = arith.constant 0 : i32
    %c0_i32_1 = arith.constant 0 : i32
    return %2, %c0_i32_0 : i32, i32
  }
  func.func @transform_1(%arg0: i32, %arg1: i32) -> (i32, i32) {
    %c1_i32 = arith.constant 1 : i32
    %0 = arith.muli %arg0, %c1_i32 : i32
    %1 = arith.addi %0, %arg1 : i32
    %c0_i32 = arith.constant 0 : i32
    %2 = arith.minsi %1, %c0_i32 : i32
    %c0_i32_0 = arith.constant 0 : i32
    %c0_i32_1 = arith.constant 0 : i32
    return %2, %c0_i32_0 : i32, i32
  }
  func.func @transform_2(%arg0: i32, %arg1: i32) -> (i32, i32) {
    %c1_i32 = arith.constant 1 : i32
    %0 = arith.muli %arg0, %c1_i32 : i32
    %1 = arith.addi %0, %arg1 : i32
    %c0_i32 = arith.constant 0 : i32
    %2 = arith.minsi %1, %c0_i32 : i32
    %c0_i32_0 = arith.constant 0 : i32
    %c0_i32_1 = arith.constant 0 : i32
    return %2, %c0_i32_0 : i32, i32
  }
  func.func @transform_3(%arg0: i32, %arg1: i32) -> (i32, i32) {
    %c1_i32 = arith.constant 1 : i32
    %0 = arith.muli %arg0, %c1_i32 : i32
    %1 = arith.addi %0, %arg1 : i32
    %c0_i32 = arith.constant 0 : i32
    %2 = arith.minsi %1, %c0_i32 : i32
    %c0_i32_0 = arith.constant 0 : i32
    %c0_i32_1 = arith.constant 0 : i32
    return %2, %c0_i32_0 : i32, i32
  }
  func.func @transform_4(%arg0: i32, %arg1: i32) -> (i32, i32) {
    %c0_i32 = arith.constant 0 : i32
    %c0_i32_0 = arith.constant 0 : i32
    return %arg0, %c0_i32 : i32, i32
  }
}

</mosaic_0001>

<bundles_post_ra>
// kernel: tpu_custom_call.1
= control target key start
LH: loop header
LB: loop body
LE: loop exit
PB: predicated region body
PF: predicated region fallthrough
CT: control target
= control target key end

     0   :  { %9 = vsyncpa [#allocation3], 0  ;;  %s332_s0 = inlined_call_operand.hbm [shape: f32[8,32], index: 0, kind: input, shape index: {}]   ;;  %s333_s1 = inlined_call_operand.hbm [shape: f32[8,32], index: 1, kind: input, shape index: {}]   ;;  %s334_s2 = inlined_call_operand.hbm [shape: f32[8,32], index: 2, kind: input, shape index: {}]   ;;  %s335_s3 = inlined_call_operand.hbm [shape: f32[8,32], index: 3, kind: input, shape index: {}]   ;;  %s336_s4 = inlined_call_operand.hbm [shape: f32[8,32], index: 4, kind: output, shape index: {}]  }
   0x1   :  { %10 = vsyncpa [#allocation6], 0 }
   0x2   :  { %11 = vsyncpa [#allocation9], 0  ;;  %s39_s17 = sshll.u32 %s333_s1, 4  ;;  %s40_s17 = int_to_ptr.hbm [resolvable:$true] %s39_s17 }
   0x3   :  { %12 = vsyncpa [#allocation4], 0  ;;  %s284_s18 = smov [#allocation5]   ;;  %s23_s22 = sshll.u32 %s332_s0, 4  ;;  %s24_s22 = int_to_ptr.hbm [resolvable:$true] %s23_s22 }
   0x4   :  { %s41_s19 = sshll.u32 %s284_s18, 4  ;;  %s285_s23 = smov [#allocation2]   ;;  %s42_s19 = int_to_ptr.vmem [resolvable:$true] %s41_s19 }
   0x5   :  { %44 = dma.hbm_to_vmem [thread:$0]  %s40_s17, 128, %s42_s19, [#allocation6]  }
   0x6   :  { %s25_s24 = sshll.u32 %s285_s23, 4  ;;  %s55_s27 = sshll.u32 %s334_s2, 4  ;;  %s26_s24 = int_to_ptr.vmem [resolvable:$true] %s25_s24  ;;  %s56_s27 = int_to_ptr.hbm [resolvable:$true] %s55_s27 }
   0x7   :  { %28 = dma.hbm_to_vmem [thread:$0]  %s24_s22, 128, %s26_s24, [#allocation3]  }
   0x8   :  { %s71_s29 = sshll.u32 %s335_s3, 4  ;;  %s286_s30 = smov [#allocation7]   ;;  %s72_s29 = int_to_ptr.hbm [resolvable:$true] %s71_s29 }
   0x9   :  { %s57_s5 = sshll.u32 %s286_s30, 4  ;;  %s287_s0 = smov [#allocation8]   ;;  %s58_s5 = int_to_ptr.vmem [resolvable:$true] %s57_s5 }
   0xa   :  { %60 = dma.hbm_to_vmem [thread:$0]  %s56_s27, 128, %s58_s5, [#allocation6]  }
   0xb   :  { %s73_s6 = sshll.u32 %s287_s0, 4  ;;  %s74_s6 = int_to_ptr.vmem [resolvable:$true] %s73_s6 }
   0xc   :  { %76 = dma.hbm_to_vmem [thread:$0]  %s72_s29, 128, %s74_s6, [#allocation9]  }
   0xd   :  { %276 = dma.done.wait [#allocation3], 128  }
   0xe   :  { %277 = vsyncadd [#allocation3], 4294967168 }
   0xf   :  { %278 = dma.done.wait [#allocation6], 256  }
  0x10   :  { %279 = vsyncadd [#allocation6], 4294967040 }
  0x11   :  { %280 = dma.done.wait [#allocation9], 128  }
  0x12   :  { %281 = vsyncadd [#allocation9], 4294967168  ;;  %vm109_vm0 = vcmask 261120   ;;  %v288_v0 = vmov 0.0   ;;  %v111_v1 = vld [vmem:[#allocation2] sm:$0xff]  ;;  %v112_v2 = vld [vmem:[#allocation5] sm:$0xff] }
  0x13   :  { %110 = vst.msk [vmem:[#allocation10] sm:$0xff] %vm109_vm0, %v288_v0  ;;  %v113_v3 = vld [vmem:[#allocation7] sm:$0xff]  ;;  %v114_v4 = vld [vmem:[#allocation8] sm:$0xff]  ;;  %s289_s2 = smov [#allocation10]   ;;  %s130_s9 = sshll.u32 %s336_s4, 4  ;;  %s131_s9 = int_to_ptr.hbm [resolvable:$true] %s130_s9 }
  0x14   :  { %v115_v5 = vmul.f32 %v113_v3, %v112_v2  ;;  %v116_v6 = vmul.f32 %v114_v4, %v111_v1  ;;  %s128_s3 = sshll.u32 %s289_s2, 4  ;;  %s129_s3 = int_to_ptr.vmem [resolvable:$true] %s128_s3 }
  0x16   :  { %v117_v8 = vadd.f32 %v116_v6, %v115_v5 }
  0x1a   :  { %v119_v7 = vld [vmem:[#allocation10] sm:$0xff] }
  0x1b   :  { %v120_v9 = vadd.f32 %v119_v7, %v117_v8 }
  0x1d   :  { %122 = vst.msk [vmem:[#allocation10] sm:$0xff] %vm109_vm0, %v120_v9 }
  0x1e   :  { %133 = dma.vmem_to_hbm [thread:$0]  %s129_s3, 128, %s131_s9, [#allocation4]  }
  0x1f   :  { %282 = dma.done.wait [#allocation4], 128  }
  0x20   :  { %283 = vsyncadd [#allocation4], 4294967168 }
  0x21   :  { %138 = vsyncpa [#allocation3], 1 }
  0x22   :  { %139 = vsyncpa [#allocation6], 1 }
  0x23   :  { %140 = vsyncpa [#allocation9], 1 }
  0x24   :  { %141 = vsyncpa [#allocation4], 1 }

</bundles_post_ra>
